<compile_context>
chip_gen: v7x
topology: tpu7x:2x2x1
jax: 0.10.0
libtpu: 0.0.40
codegen_flags: <defaults>
</compile_context>

<pallas_src>
import functools

import jax
import jax.numpy as jnp
from jax import lax
from jax.experimental import pallas as pl
from jax.experimental.pallas import tpu as pltpu

BETA = 0.01


def _fsc_kernel(*refs, batch, tb, has_weights):
    if has_weights:
        (feat_ref, sem_ref, w_ref, b_ref, wrow_ref,
         sim_ref, l2_ref, acc_ref) = refs
    else:
        (feat_ref, sem_ref, w_ref, b_ref,
         sim_ref, l2_ref, acc_ref) = refs
        wrow_ref = None

    p = pl.program_id(0)
    j = pl.program_id(1)
    inner = pl.num_programs(1)

    @pl.when(j == 0)
    def _():
        acc_ref[0] = jnp.float32(0.0)
        acc_ref[1] = jnp.float32(0.0)

    x = feat_ref[...].astype(jnp.float32)            # (tb, F)
    s = sem_ref[...].astype(jnp.float32)             # (tb, S)
    w = w_ref[...]                                   # (S, F)  pre-transposed f32
    b = b_ref[...]                                   # (1, F)  f32

    # nn.Linear: proj = semantics @ W.T + b ; W is pre-transposed in the wrapper so
    # this is the canonical (tb,S)@(S,F) MXU contraction (no per-step RHS layout work).
    proj = jnp.dot(s, w, preferred_element_type=jnp.float32) + b   # (tb, F)

    # F.normalize(., dim=1) folded into per-row rsqrt scale factors (EUP); the
    # normalized (tb, F) matrices are never materialized — only (tb, 1) columns.
    xss = jnp.sum(x * x, axis=1, keepdims=True)      # (tb, 1)
    xinv = lax.rsqrt(jnp.maximum(xss, 1e-24))        # == 1 / max(||x||, 1e-12)
    pss = jnp.sum(proj * proj, axis=1, keepdims=True)
    pinv = lax.rsqrt(jnp.maximum(pss, 1e-24))

    if has_weights:
        rowdot = jnp.sum((x * wrow_ref[...]) * proj, axis=1, keepdims=True)
    else:
        rowdot = jnp.sum(x * proj, axis=1, keepdims=True)
    sim = rowdot * (xinv * pinv)                     # (tb, 1) cosine similarity
    l2 = xss * (xinv * xinv)                         # (tb, 1) ||normalize(x)||^2

    # Ragged-batch masking (replaces the old jnp.pad HBM copy). Uses the *logical*
    # tile index, so a clamped duplicate tail tile (when the tile count does not
    # divide evenly across the parallel split) also contributes exactly zero.
    t_logical = p * inner + j
    rows = t_logical * tb + lax.broadcasted_iota(jnp.int32, (tb, 1), 0)
    mask = rows < batch

    acc_ref[0] += jnp.sum(jnp.where(mask, sim, 0.0))
    acc_ref[1] += jnp.sum(jnp.where(mask, l2, 0.0))

    @pl.when(j == inner - 1)
    def _():
        # Lane-dense partial-sum blocks (one per parallel chunk); summed in wrapper.
        sim_ref[...] = jnp.full(sim_ref.shape, acc_ref[0], jnp.float32)
        l2_ref[...] = jnp.full(l2_ref.shape, acc_ref[1], jnp.float32)


def feature_semantic_consistency_loss(features, semantics, proj_weight, proj_bias,
                                      weights=None, beta=BETA, tb=None):
    B, F = features.shape
    _, S = semantics.shape
    assert proj_weight.shape == (F, S)

    # One-time (outside-kernel) prep of resident parameters: transpose + f32 cast,
    # so no per-iteration converts/layout work run on resident VMEM blocks.
    wt = jnp.asarray(proj_weight, jnp.float32).T            # (S, F)
    brow = jnp.asarray(proj_bias, jnp.float32).reshape(1, F)

    has_weights = weights is not None
    inputs = [features, semantics, wt, brow]
    if has_weights:
        inputs.append(jnp.asarray(weights, jnp.float32).reshape(1, F))

    # Batch tile: the biggest that fits a ~24 MiB streaming budget (double-buffered
    # feature + semantics tiles plus projection intermediate), capped at 1024 rows.
    if tb is None:
        budget = 24 * 1024 * 1024
        per_row = 4 * (4 * F + 2 * S)
        tb = max(8, min(1024, (budget // max(per_row, 1)) // 8 * 8))
    if tb >= B:
        tb = B                      # single full-batch tile (block dim == full dim)
    else:
        tb = max(8, (tb // 8) * 8)  # tiled path: keep the sublane dim 8-aligned
    n_tiles = -(-B // tb)

    # Two-way parallel split over tiles -> both v7x TensorCores; on single-TC
    # v5e/v6e the parallel axis just runs sequentially (no correctness impact).
    P = 2 if n_tiles >= 2 else 1
    inner = -(-n_tiles // P)

    def row_block(p, j):
        t = p * inner + j
        return (jnp.minimum(t, n_tiles - 1), 0)   # clamp; duplicates masked in-kernel

    const2 = lambda p, j: (0, 0)

    in_specs = [
        pl.BlockSpec((tb, F), row_block),          # features tile
        pl.BlockSpec((tb, S), row_block),          # semantics tile
        pl.BlockSpec((S, F), const2),              # resident projection weight (S,F)
        pl.BlockSpec((1, F), const2),              # projection bias
    ]
    if has_weights:
        in_specs.append(pl.BlockSpec((1, F), const2))   # elementwise feature weights

    # Explicit VMEM budget: double-buffered streaming tiles + 2 copies of the
    # resident weight (conservative, in case the constant index_map is still
    # double-buffered) + headroom. Raised past v5e's 16 MiB default, capped well
    # under v7x's 64 MiB physical VMEM.
    vmem_est = 4 * (2 * tb * F + 2 * tb * S + 2 * S * F + 2 * tb * F + 4 * F) + (1 << 20)
    vmem_limit = int(min(48 * 1024 * 1024, max(32 * 1024 * 1024, vmem_est)))

    kernel = functools.partial(_fsc_kernel, batch=B, tb=tb, has_weights=has_weights)
    sim_part, l2_part = pl.pallas_call(
        kernel,
        out_shape=(jax.ShapeDtypeStruct((P, 8, 128), jnp.float32),
                   jax.ShapeDtypeStruct((P, 8, 128), jnp.float32)),
        grid=(P, inner),
        in_specs=in_specs,
        out_specs=(pl.BlockSpec((1, 8, 128), lambda p, j: (p, 0, 0)),
                   pl.BlockSpec((1, 8, 128), lambda p, j: (p, 0, 0))),
        scratch_shapes=[pltpu.SMEM((2,), jnp.float32)],   # [sum_sim, sum_l2] per chunk
        compiler_params=pltpu.CompilerParams(
            dimension_semantics=("parallel", "arbitrary"),
            vmem_limit_bytes=vmem_limit),
    )(*inputs)

    sim_total = jnp.sum(sim_part[:, 0, 0])
    l2_total = jnp.sum(l2_part[:, 0, 0])
    inv_b = jnp.float32(1.0 / B)
    return (1.0 - sim_total * inv_b) + jnp.float32(beta) * (l2_total * inv_b)


def init_projection(key, in_features, out_features):
    """Mirror the module's lazy nn.Linear(S, F) with orthogonal_ weight init."""
    wkey, bkey = jax.random.split(key)
    w = jax.nn.initializers.orthogonal()(wkey, (out_features, in_features), jnp.float32)
    bound = 1.0 / (in_features ** 0.5)
    b = jax.random.uniform(bkey, (out_features,), jnp.float32, -bound, bound)
    return w, b


def feature_semantic_consistency_loss_ref(features, semantics, proj_weight, proj_bias,
                                          weights=None, beta=BETA):
    """Pure-JAX reference mirroring the PyTorch forward exactly."""
    x = features.astype(jnp.float32)
    proj = semantics.astype(jnp.float32) @ proj_weight.astype(jnp.float32).T + proj_bias
    xn = x / jnp.maximum(jnp.linalg.norm(x, axis=1, keepdims=True), 1e-12)
    pn = proj / jnp.maximum(jnp.linalg.norm(proj, axis=1, keepdims=True), 1e-12)
    if weights is not None:
        sim = jnp.sum((xn * weights[None, :]) * pn, axis=1)
    else:
        sim = jnp.sum(xn * pn, axis=1)
    consistency = 1.0 - jnp.mean(sim)
    l2 = jnp.mean(jnp.sum(xn * xn, axis=1))
    return consistency + beta * l2


if __name__ == "__main__":
    key = jax.random.PRNGKey(0)
    kf, ks, kp, kw, kf2, ks2 = jax.random.split(key, 6)

    B, F, S = 8, 32, 16
    features = jax.random.normal(kf, (B, F), dtype=jnp.float32)
    semantics = jax.random.normal(ks, (B, S), dtype=jnp.float32)
    W, bvec = init_projection(kp, S, F)

    # Unweighted path (weights=None in the module forward).
    loss = feature_semantic_consistency_loss(features, semantics, W, bvec)
    jax.block_until_ready(loss)
    loss_ref = feature_semantic_consistency_loss_ref(features, semantics, W, bvec)
    assert jnp.allclose(loss, loss_ref, rtol=1e-5, atol=1e-5), (loss, loss_ref)

    # Weighted path.
    weights = jax.random.uniform(kw, (F,), jnp.float32, minval=0.5, maxval=1.5)
    loss_w = feature_semantic_consistency_loss(features, semantics, W, bvec, weights)
    jax.block_until_ready(loss_w)
    loss_w_ref = feature_semantic_consistency_loss_ref(features, semantics, W, bvec, weights)
    assert jnp.allclose(loss_w, loss_w_ref, rtol=1e-5, atol=1e-5), (loss_w, loss_w_ref)

    # Ragged batch + multi-tile + 2-way parallel split + clamped tail tile:
    # exercises the in-kernel masking path (no jnp.pad HBM copies).
    B2 = 40
    features2 = jax.random.normal(kf2, (B2, F), dtype=jnp.float32)
    semantics2 = jax.random.normal(ks2, (B2, S), dtype=jnp.float32)
    loss2 = feature_semantic_consistency_loss(features2, semantics2, W, bvec,
                                              weights, tb=16)
    jax.block_until_ready(loss2)
    loss2_ref = feature_semantic_consistency_loss_ref(features2, semantics2, W, bvec,
                                                      weights)
    assert jnp.allclose(loss2, loss2_ref, rtol=1e-5, atol=1e-5), (loss2, loss2_ref)

    print("KERNEL_OK")
</pallas_src>

<mosaic_0001>
module attributes {stable_mosaic.version = 11 : i64} {
  func.func @_fsc_kernel(%arg0: i32, %arg1: i32, %arg2: memref<8x32xf32, #tpu.memory_space<vmem>>, %arg3: memref<8x16xf32, #tpu.memory_space<vmem>>, %arg4: memref<16x32xf32, #tpu.memory_space<vmem>>, %arg5: memref<1x32xf32, #tpu.memory_space<vmem>>, %arg6: memref<1x8x128xf32, #tpu.memory_space<vmem>>, %arg7: memref<1x8x128xf32, #tpu.memory_space<vmem>>, %arg8: memref<2xf32, #tpu.memory_space<smem>>) attributes {dimension_semantics = [#tpu.dimension_semantics<parallel>, #tpu.dimension_semantics<arbitrary>], iteration_bounds = array<i64: 1, 1>, scalar_prefetch = 0 : i64, scratch_operands = 1 : i64, tpu.core_type = #tpu.core_type<tc>, window_params = [{transform_indices = @transform_0, window_bounds = array<i64: 8, 32>}, {transform_indices = @transform_1, window_bounds = array<i64: 8, 16>}, {pipeline_mode = #tpu.pipeline_mode<synchronous>, transform_indices = @transform_2, window_bounds = array<i64: 16, 32>}, {pipeline_mode = #tpu.pipeline_mode<synchronous>, transform_indices = @transform_3, window_bounds = array<i64: 1, 32>}, {transform_indices = @transform_4, window_bounds = array<i64: 1, 8, 128>}, {transform_indices = @transform_5, window_bounds = array<i64: 1, 8, 128>}]} {
    %c0_i32 = arith.constant 0 : i32
    %0 = arith.cmpi eq, %arg1, %c0_i32 : i32
    %1 = arith.extui %0 : i1 to i32
    %c0_i32_0 = arith.constant 0 : i32
    %2 = arith.cmpi ne, %1, %c0_i32_0 : i32
    scf.if %2 {
      %cst_23 = arith.constant 0.000000e+00 : f32
      %c0_24 = arith.constant 0 : index
      %58 = memref.load %arg8[%c0_24] : memref<2xf32, #tpu.memory_space<smem>>
      memref.store %cst_23, %arg8[%c0_24] : memref<2xf32, #tpu.memory_space<smem>>
      %cst_25 = arith.constant 0.000000e+00 : f32
      %c1_26 = arith.constant 1 : index
      %59 = memref.load %arg8[%c1_26] : memref<2xf32, #tpu.memory_space<smem>>
      memref.store %cst_25, %arg8[%c1_26] : memref<2xf32, #tpu.memory_space<smem>>
    } else {
    }
    %c0 = arith.constant 0 : index
    %c0_1 = arith.constant 0 : index
    %3 = vector.load %arg2[%c0, %c0_1] : memref<8x32xf32, #tpu.memory_space<vmem>>, vector<8x32xf32>
    %c0_2 = arith.constant 0 : index
    %c0_3 = arith.constant 0 : index
    %4 = vector.load %arg3[%c0_2, %c0_3] : memref<8x16xf32, #tpu.memory_space<vmem>>, vector<8x16xf32>
    %c0_4 = arith.constant 0 : index
    %c0_5 = arith.constant 0 : index
    %5 = vector.load %arg4[%c0_4, %c0_5] : memref<16x32xf32, #tpu.memory_space<vmem>>, vector<16x32xf32>
    %c0_6 = arith.constant 0 : index
    %c0_7 = arith.constant 0 : index
    %6 = vector.load %arg5[%c0_6, %c0_7] : memref<1x32xf32, #tpu.memory_space<vmem>>, vector<1x32xf32>
    %cst = arith.constant dense<0.000000e+00> : vector<8x32xf32>
    %7 = tpu.matmul %4, %5, %cst {dimension_numbers = #tpu.dot_dimension_numbers<[1], [0], [0], [1], [0, 0, 1, 1], [], []>} : vector<8x16xf32>, vector<16x32xf32>, vector<8x32xf32> -> vector<8x32xf32>
    %8 = vector.broadcast %6 : vector<1x32xf32> to vector<8x32xf32>
    %9 = arith.addf %7, %8 : vector<8x32xf32>
    %10 = arith.mulf %3, %3 : vector<8x32xf32>
    %cst_8 = arith.constant dense<0.000000e+00> : vector<8xf32>
    %11 = vector.multi_reduction <add>, %10, %cst_8 [1] : vector<8x32xf32> to vector<8xf32>
    %12 = vector.shape_cast %11 : vector<8xf32> to vector<8x1xf32>
    %cst_9 = arith.constant 1.000000e-24 : f32
    %13 = vector.broadcast %cst_9 : f32 to vector<8x1xf32>
    %14 = arith.maximumf %12, %13 : vector<8x1xf32>
    %15 = math.rsqrt %14 : vector<8x1xf32>
    %16 = arith.mulf %9, %9 : vector<8x32xf32>
    %cst_10 = arith.constant dense<0.000000e+00> : vector<8xf32>
    %17 = vector.multi_reduction <add>, %16, %cst_10 [1] : vector<8x32xf32> to vector<8xf32>
    %18 = vector.shape_cast %17 : vector<8xf32> to vector<8x1xf32>
    %cst_11 = arith.constant 1.000000e-24 : f32
    %19 = vector.broadcast %cst_11 : f32 to vector<8x1xf32>
    %20 = arith.maximumf %18, %19 : vector<8x1xf32>
    %21 = math.rsqrt %20 : vector<8x1xf32>
    %22 = arith.mulf %3, %9 : vector<8x32xf32>
    %cst_12 = arith.constant dense<0.000000e+00> : vector<8xf32>
    %23 = vector.multi_reduction <add>, %22, %cst_12 [1] : vector<8x32xf32> to vector<8xf32>
    %24 = vector.shape_cast %23 : vector<8xf32> to vector<8x1xf32>
    %25 = arith.mulf %15, %21 : vector<8x1xf32>
    %26 = arith.mulf %24, %25 : vector<8x1xf32>
    %27 = arith.mulf %15, %15 : vector<8x1xf32>
    %28 = arith.mulf %12, %27 : vector<8x1xf32>
    %c1_i32 = arith.constant 1 : i32
    %29 = arith.muli %arg0, %c1_i32 : i32
    %30 = arith.addi %29, %arg1 : i32
    %c8_i32 = arith.constant 8 : i32
    %31 = arith.muli %30, %c8_i32 : i32
    %32 = tpu.iota {dimensions = array<i32: 0>} : vector<8x1xi32>
    %33 = vector.broadcast %31 : i32 to vector<8x1xi32>
    %34 = arith.addi %33, %32 : vector<8x1xi32>
    %c8_i32_13 = arith.constant 8 : i32
    %35 = vector.broadcast %c8_i32_13 : i32 to vector<8x1xi32>
    %36 = arith.cmpi slt, %34, %35 : vector<8x1xi32>
    %c0_14 = arith.constant 0 : index
    %37 = memref.load %arg8[%c0_14] : memref<2xf32, #tpu.memory_space<smem>>
    %cst_15 = arith.constant 0.000000e+00 : f32
    %38 = vector.broadcast %cst_15 : f32 to vector<8x1xf32>
    %39 = arith.select %36, %26, %38 : vector<8x1xi1>, vector<8x1xf32>
    %40 = vector.shape_cast %39 : vector<8x1xf32> to vector<1x8x1xf32>
    %cst_16 = arith.constant dense<0.000000e+00> : vector<1xf32>
    %41 = vector.multi_reduction <add>, %40, %cst_16 [1, 2] : vector<1x8x1xf32> to vector<1xf32>
    %42 = vector.shape_cast %41 : vector<1xf32> to vector<1x1x1xf32>
    %43 = vector.extract %42[0, 0, 0] : f32 from vector<1x1x1xf32>
    %44 = arith.addf %37, %43 : f32
    %c0_17 = arith.constant 0 : index
    %45 = memref.load %arg8[%c0_17] : memref<2xf32, #tpu.memory_space<smem>>
    memref.store %44, %arg8[%c0_17] : memref<2xf32, #tpu.memory_space<smem>>
    %c1 = arith.constant 1 : index
    %46 = memref.load %arg8[%c1] : memref<2xf32, #tpu.memory_space<smem>>
    %cst_18 = arith.constant 0.000000e+00 : f32
    %47 = vector.broadcast %cst_18 : f32 to vector<8x1xf32>
    %48 = arith.select %36, %28, %47 : vector<8x1xi1>, vector<8x1xf32>
    %49 = vector.shape_cast %48 : vector<8x1xf32> to vector<1x8x1xf32>
    %cst_19 = arith.constant dense<0.000000e+00> : vector<1xf32>
    %50 = vector.multi_reduction <add>, %49, %cst_19 [1, 2] : vector<1x8x1xf32> to vector<1xf32>
    %51 = vector.shape_cast %50 : vector<1xf32> to vector<1x1x1xf32>
    %52 = vector.extract %51[0, 0, 0] : f32 from vector<1x1x1xf32>
    %53 = arith.addf %46, %52 : f32
    %c1_20 = arith.constant 1 : index
    %54 = memref.load %arg8[%c1_20] : memref<2xf32, #tpu.memory_space<smem>>
    memref.store %53, %arg8[%c1_20] : memref<2xf32, #tpu.memory_space<smem>>
    %c0_i32_21 = arith.constant 0 : i32
    %55 = arith.cmpi eq, %arg1, %c0_i32_21 : i32
    %56 = arith.extui %55 : i1 to i32
    %c0_i32_22 = arith.constant 0 : i32
    %57 = arith.cmpi ne, %56, %c0_i32_22 : i32
    scf.if %57 {
      %c0_23 = arith.constant 0 : index
      %58 = memref.load %arg8[%c0_23] : memref<2xf32, #tpu.memory_space<smem>>
      %59 = vector.broadcast %58 : f32 to vector<1x8x128xf32>
      %c0_24 = arith.constant 0 : index
      %c0_25 = arith.constant 0 : index
      %c0_26 = arith.constant 0 : index
      %60 = vector.load %arg6[%c0_24, %c0_25, %c0_26] : memref<1x8x128xf32, #tpu.memory_space<vmem>>, vector<1x8x128xf32>
      tpu.vector_store %arg6[%c0_24, %c0_25, %c0_26], %59 {strides = array<i32>} : memref<1x8x128xf32, #tpu.memory_space<vmem>>, vector<1x8x128xf32>,
      %c1_27 = arith.constant 1 : index
      %61 = memref.load %arg8[%c1_27] : memref<2xf32, #tpu.memory_space<smem>>
      %62 = vector.broadcast %61 : f32 to vector<1x8x128xf32>
      %c0_28 = arith.constant 0 : index
      %c0_29 = arith.constant 0 : index
      %c0_30 = arith.constant 0 : index
      %63 = vector.load %arg7[%c0_28, %c0_29, %c0_30] : memref<1x8x128xf32, #tpu.memory_space<vmem>>, vector<1x8x128xf32>
      tpu.vector_store %arg7[%c0_28, %c0_29, %c0_30], %62 {strides = array<i32>} : memref<1x8x128xf32, #tpu.memory_space<vmem>>, vector<1x8x128xf32>,
    } else {
    }
    return
  }
  func.func @transform_0(%arg0: i32, %arg1: i32) -> (i32, i32) {
    %c1_i32 = arith.constant 1 : i32
    %0 = arith.muli %arg0, %c1_i32 : i32
    %1 = arith.addi %0, %arg1 : i32
    %c0_i32 = arith.constant 0 : i32
    %2 = arith.minsi %1, %c0_i32 : i32
    %c0_i32_0 = arith.constant 0 : i32
    %c0_i32_1 = arith.constant 0 : i32
    return %2, %c0_i32_0 : i32, i32
  }
  func.func @transform_1(%arg0: i32, %arg1: i32) -> (i32, i32) {
    %c1_i32 = arith.constant 1 : i32
    %0 = arith.muli %arg0, %c1_i32 : i32
    %1 = arith.addi %0, %arg1 : i32
    %c0_i32 = arith.constant 0 : i32
    %2 = arith.minsi %1, %c0_i32 : i32
    %c0_i32_0 = arith.constant 0 : i32
    %c0_i32_1 = arith.constant 0 : i32
    return %2, %c0_i32_0 : i32, i32
  }
  func.func @transform_2(%arg0: i32, %arg1: i32) -> (i32, i32) {
    %c0_i32 = arith.constant 0 : i32
    %c0_i32_0 = arith.constant 0 : i32
    %c0_i32_1 = arith.constant 0 : i32
    return %c0_i32, %c0_i32_0 : i32, i32
  }
  func.func @transform_3(%arg0: i32, %arg1: i32) -> (i32, i32) {
    %c0_i32 = arith.constant 0 : i32
    %c0_i32_0 = arith.constant 0 : i32
    %c0_i32_1 = arith.constant 0 : i32
    return %c0_i32, %c0_i32_0 : i32, i32
  }
  func.func @transform_4(%arg0: i32, %arg1: i32) -> (i32, i32, i32) {
    %c0_i32 = arith.constant 0 : i32
    %c0_i32_0 = arith.constant 0 : i32
    %c0_i32_1 = arith.constant 0 : i32
    return %arg0, %c0_i32, %c0_i32_0 : i32, i32, i32
  }
  func.func @transform_5(%arg0: i32, %arg1: i32) -> (i32, i32, i32) {
    %c0_i32 = arith.constant 0 : i32
    %c0_i32_0 = arith.constant 0 : i32
    %c0_i32_1 = arith.constant 0 : i32
    return %arg0, %c0_i32, %c0_i32_0 : i32, i32, i32
  }
}

</mosaic_0001>

<bundles_post_ra>
// kernel: tpu_custom_call.1
= control target key start
LH: loop header
LB: loop body
LE: loop exit
PB: predicated region body
PF: predicated region fallthrough
CT: control target
= control target key end

     0   :  { %11 = vsyncpa [#allocation4], 0  ;;  %s535_s0 = inlined_call_operand.hbm [shape: f32[8,32], index: 0, kind: input, shape index: {}]   ;;  %s536_s1 = inlined_call_operand.hbm [shape: f32[8,16], index: 1, kind: input, shape index: {}]   ;;  %s537_s2 = inlined_call_operand.hbm [shape: f32[16,32], index: 2, kind: input, shape index: {}]   ;;  %s538_s3 = inlined_call_operand.vmem [shape: f32[1,32], index: 3, kind: input, shape index: {}]   ;;  %s539_s4 = inlined_call_operand.hbm [shape: f32[1,8,128], index: 4, kind: output, shape index: {0}]   ;;  %s540_s5 = inlined_call_operand.hbm [shape: f32[1,8,128], index: 5, kind: output, shape index: {1}]  }
   0x1   :  { %12 = vsyncpa [#allocation7], 0 }
   0x2   :  { %13 = vsyncpa [#allocation5], 0 }
   0x3   :  { %14 = vsyncpa [#allocation11], 0  ;;  %s422_s18 = smov [#allocation6]   ;;  %s423_s20 = smov [#allocation3]  }
   0x4   :  { %s41_s19 = sshll.u32 %s422_s18, 4  ;;  %s26_s21 = sshll.u32 %s423_s20, 4  ;;  %s42_s19 = int_to_ptr.vmem [resolvable:$true] %s41_s19  ;;  %s27_s21 = int_to_ptr.vmem [resolvable:$true] %s26_s21 }
   0x5   :  { %s304_s24 = scalar_lea.hbm %s536_s1, 128 }
   0x6   :  { %p305_p0 = scmp.ne.s32.totalorder %s536_s1, %s304_s24  ;;  %p308_p1 = scmp.lt.u32.totalorder %s304_s24, %s536_s1 }
   0x8   :  { %p310_p2 = pnand %p308_p1, %p305_p0 }
   0xa   :  { %313 = shalt.err (!%p310_p2)
}
   0xb   :  { %s314_s29 = scalar_lea.vmem %s42_s19, 128  ;;  %p319_p4 = scmp.lt.s32.totalorder %s42_s19, %s42_s19 }
   0xc   :  { %p315_p3 = scmp.ne.s32.totalorder %s42_s19, %s314_s29  ;;  %p320_p5 = scmp.lt.s32.totalorder %s314_s29, %s314_s29 }
   0xe   :  { %p321_p6 = por %p320_p5, %p319_p4 }
  0x10   :  { %p322_p7 = pnand %p321_p6, %p315_p3 }
  0x12   :  { %325 = shalt.err (!%p322_p7)
}
  0x13   :  { %44 = dma.hbm_to_vmem [thread:$0]  %s536_s1, 128, %s42_s19, [#allocation7]  }
  0x14   :  { %s326_s9 = scalar_lea.hbm %s535_s0, 128 }
  0x15   :  { %p327_p8 = scmp.ne.s32.totalorder %s535_s0, %s326_s9  ;;  %p330_p9 = scmp.lt.u32.totalorder %s326_s9, %s535_s0 }
  0x17   :  { %p332_p10 = pnand %p330_p9, %p327_p8 }
  0x19   :  { %335 = shalt.err (!%p332_p10)
}
  0x1a   :  { %s336_s14 = scalar_lea.vmem %s27_s21, 128  ;;  %p341_p12 = scmp.lt.s32.totalorder %s27_s21, %s27_s21 }
  0x1b   :  { %p337_p11 = scmp.ne.s32.totalorder %s27_s21, %s336_s14  ;;  %p342_p13 = scmp.lt.s32.totalorder %s336_s14, %s336_s14 }
  0x1d   :  { %p343_p0 = por %p342_p13, %p341_p12 }
  0x1f   :  { %p344_p1 = pnand %p343_p0, %p337_p11 }
  0x21   :  { %347 = shalt.err (!%p344_p1)
}
  0x22   :  { %29 = dma.hbm_to_vmem [thread:$0]  %s535_s0, 128, %s27_s21, [#allocation4]  }
  0x23   :  { %s424_s16 = smov [#allocation8]   ;;  %s348_s20 = scalar_lea.hbm %s537_s2, 256 }
  0x24   :  { %s50_s17 = sshll.u32 %s424_s16, 4  ;;  %p349_p2 = scmp.ne.s32.totalorder %s537_s2, %s348_s20  ;;  %s51_s17 = int_to_ptr.vmem [resolvable:$true] %s50_s17 }
  0x25   :  { %p352_p3 = scmp.lt.u32.totalorder %s348_s20, %s537_s2 }
  0x27   :  { %p354_p4 = pnand %p352_p3, %p349_p2 }
  0x29   :  { %357 = shalt.err (!%p354_p4)
}
  0x2a   :  { %s358_s26 = scalar_lea.vmem %s51_s17, 256  ;;  %p363_p6 = scmp.lt.s32.totalorder %s51_s17, %s51_s17 }
  0x2b   :  { %p359_p5 = scmp.ne.s32.totalorder %s51_s17, %s358_s26  ;;  %p364_p7 = scmp.lt.s32.totalorder %s358_s26, %s358_s26 }
  0x2d   :  { %p365_p8 = por %p364_p7, %p363_p6 }
  0x2f   :  { %p366_p9 = pnand %p365_p8, %p359_p5 }
  0x31   :  { %369 = shalt.err (!%p366_p9)
}
  0x32   :  { %s425_s0 = smov 128   ;;  %s426_s21 = smov 8  }
  0x33   :  { %56 = dma.hbm_to_vmem [thread:$0]  %s537_s2, 256, %s51_s17, [#allocation7], %s425_s0, %s425_s0, %s426_s21  }
  0x34   :  { %414 = dma.done.wait [#allocation4], 128  }
  0x35   :  { %415 = vsyncadd [#allocation4], 4294967168 }
  0x36   :  { %416 = dma.done.wait [#allocation7], 384  }
  0x37   :  { %417 = vsyncadd [#allocation7], 4294966912  ;;  %v427_v0 = vmov 0.0|0.0   ;;  %vm428_vm0 = vmmov 0   ;;  %v429_v1 = vmov 0.0   ;;  %v84_v2 = vld [vmem:[#allocation8] sm:$0xff] }
  0x38   :  { %283 = vmatprep.subr.bf16.mxu0 %v427_v0  ;;  %280 = vmatprep.mubr.msk.f32.mxu0 %vm428_vm0, %v429_v1  ;;  %v85_v3 = vld [vmem:[#allocation8 + $0x8] sm:$0xff]  ;;  %v82_v5 = vld [vmem:[#allocation3] sm:$0xff]  ;;  %vm168_vm1 = vcmask 261120   ;;  %v83_v7 = vld [vmem:[#allocation6] sm:$0xff]  ;;  %vm93_vm2 = vcmask 130048   ;;  %vm197_vm3 = vcmask 7168  }
  0x39   :  { %v284_v4 = vpack.c.bf16 %v85_v3, %v84_v2  ;;  %v167_v6 = vmul.f32 %v82_v5, %v82_v5  ;;  %v269_v12 = vld [vmem:[%s538_s3] ss:$0 sm:$0xff]  ;;  %s430_s3 = smov [#allocation9]   ;;  %s431_s6 = smov [#allocation10]  }
  0x3a   :  { %s241_s30 = sshll.u32 %s430_s3, 4  ;;  %s251_s7 = sshll.u32 %s431_s6, 4  ;;  %s242_s30 = int_to_ptr.vmem [resolvable:$true] %s241_s30  ;;  %s504_s7 = int_to_ptr.vmem [resolvable:$true] %s251_s7 }
  0x3b   :  { %285 = vmatpush3.bf16.msra.mxu0 %v284_v4  ;;  %v169_v8 = vsel %vm168_vm1, %v167_v6, 0.0  ;;  %s370_s10 = scalar_lea.vmem %s242_s30, 128  ;;  %p375_p11 = scmp.lt.s32.totalorder %s242_s30, %s242_s30 }
  0x3c   :  { %170 = vadd.xlane.f32.xlu0 %v169_v8  ;;  %p371_p10 = scmp.ne.s32.totalorder %s242_s30, %s370_s10  ;;  %p376_p12 = scmp.lt.s32.totalorder %s370_s10, %s370_s10 }
  0x3e   :  { %281 = vmatmul.mubr.msk.f32.vlgmr.msra.gmra.mrb[0].mxu0 %vm93_vm2, %v83_v7  ;;  %p377_p13 = por %p376_p12, %p375_p11 }
  0x40   :  { %p378_p0 = pnand %p377_p13, %p371_p10 }
  0xc9   :  { %v171_v9 = vpop.xlane.xlu0 %170 }
  0xca   :  { %v172_v10 = vmax.f32 %v171_v9, 1e-24 }
  0xcc   :  { %300 = vrsqrt.f32 %v172_v10 }
  0xd6   :  { %v301_v11 = vpop.eup %300 }
  0xd7   :  { %v186_v13 = vmul.f32 %v301_v11, %v301_v11 }
  0xd9   :  { %v187_v19 = vmul.f32 %v186_v13, %v171_v9 }
  0xdb   :  { %v213_v22 = vsel %vm197_vm3, %v187_v19, 0.0 }
 0x111   :  { %v163_v14 = vpop.f32.mrb[0].mxu0 }
 0x112   :  { %v164_v15 = vadd.f32 %v269_v12, %v163_v14  ;;  %v282_v16 = vpop.f32.mrb[1].mxu0 }
 0x114   :  { %v180_v17 = vmul.f32 %v164_v15, %v82_v5  ;;  %v174_v18 = vmul.f32 %v164_v15, %v164_v15 }
 0x116   :  { %v181_v20 = vsel %vm168_vm1, %v180_v17, 0.0  ;;  %v175_v21 = vsel %vm168_vm1, %v174_v18, 0.0 }
 0x117   :  { %182 = vadd.xlane.f32.xlu1 %v181_v20  ;;  %176 = vadd.xlane.f32.xlu0 %v175_v21 }
 0x11b   :  { %214 = vadd.xlane.f32.xlu0 %v213_v22 }
 0x1a4   :  { %v177_v23 = vpop.xlane.xlu0 %176  ;;  %v183_v27 = vpop.xlane.xlu1 %182 }
 0x1a5   :  { %v178_v24 = vmax.f32 %v177_v23, 1e-24 }
 0x1a7   :  { %302 = vrsqrt.f32 %v178_v24 }
 0x1a8   :  { %v215_v30 = vpop.xlane.xlu0 %214 }
 0x1a9   :  { %v216_v31 = vrot.slane %v215_v30, 4 }
 0x1ab   :  { %v217_v32 = vadd.f32 %v216_v31, %v215_v30 }
 0x1ad   :  { %v218_v33 = vrot.slane %v217_v32, 2 }
 0x1af   :  { %v219_v37 = vadd.f32 %v218_v33, %v217_v32 }
 0x1b1   :  { %v303_v25 = vpop.eup %302  ;;  %v220_v40 = vrot.slane %v219_v37, 1 }
 0x1b2   :  { %v184_v26 = vmul.f32 %v303_v25, %v301_v11 }
 0x1b3   :  { %v221_v43 = vadd.f32 %v220_v40, %v219_v37 }
 0x1b4   :  { %v185_v28 = vmul.f32 %v184_v26, %v183_v27 }
 0x1b6   :  { %v198_v29 = vsel %vm197_vm3, %v185_v28, 0.0 }
 0x1b7   :  { %199 = vadd.xlane.f32.xlu1 %v198_v29 }
 0x244   :  { %v200_v34 = vpop.xlane.xlu1 %199 }
 0x245   :  { %v201_v35 = vrot.slane %v200_v34, 4 }
 0x247   :  { %v202_v36 = vadd.f32 %v201_v35, %v200_v34 }
 0x249   :  { %v203_v38 = vrot.slane %v202_v36, 2 }
 0x24b   :  { %v204_v39 = vadd.f32 %v203_v38, %v202_v36 }
 0x24d   :  { %v205_v41 = vrot.slane %v204_v39, 1 }
 0x24f   :  { %v206_v42 = vadd.f32 %v205_v41, %v204_v39 }
 0x251   :  { %286 = vpush %v206_v42 }
 0x252   :  { %288 = vpush %v221_v43 }
 0x282   :  { %s287_s8 = spop %286 }
 0x283   :  { %v230_v44 = vstv %s287_s8  ;;  %s289_s9 = spop %288 }
 0x284   :  { %231 = vst [vmem:[#allocation9] sm:$0xff] %v230_v44  ;;  %v233_v45 = vstv %s289_s9 }
 0x285   :  { %234 = vst [vmem:[#allocation10] sm:$0xff] %v233_v45 }
 0x286   :  { %381 = shalt.err (!%p378_p0)
}
 0x287   :  { %s382_s13 = scalar_lea.hbm %s539_s4, 128 }
 0x288   :  { %p383_p1 = scmp.ne.s32.totalorder %s539_s4, %s382_s13  ;;  %p386_p2 = scmp.lt.u32.totalorder %s382_s13, %s539_s4 }
 0x28a   :  { %p388_p3 = pnand %p386_p2, %p383_p1 }
 0x28c   :  { %391 = shalt.err (!%p388_p3)
}
 0x28d   :  { %244 = dma.vmem_to_hbm [thread:$0]  %s242_s30, 128, %s539_s4, [#allocation5]  }
 0x28e   :  { %s392_s19 = scalar_lea.vmem %s504_s7, 128  ;;  %p397_p5 = scmp.lt.s32.totalorder %s504_s7, %s504_s7 }
 0x28f   :  { %p393_p4 = scmp.ne.s32.totalorder %s504_s7, %s392_s19  ;;  %p398_p6 = scmp.lt.s32.totalorder %s392_s19, %s392_s19 }
 0x291   :  { %p399_p7 = por %p398_p6, %p397_p5 }
 0x293   :  { %p400_p8 = pnand %p399_p7, %p393_p4 }
 0x295   :  { %403 = shalt.err (!%p400_p8)
}
 0x296   :  { %s404_s23 = scalar_lea.hbm %s540_s5, 128 }
 0x297   :  { %p405_p9 = scmp.ne.s32.totalorder %s540_s5, %s404_s23  ;;  %p408_p10 = scmp.lt.u32.totalorder %s404_s23, %s540_s5 }
 0x299   :  { %p410_p11 = pnand %p408_p10, %p405_p9 }
 0x29b   :  { %413 = shalt.err (!%p410_p11)
}
 0x29c   :  { %254 = dma.vmem_to_hbm [thread:$0]  %s504_s7, 128, %s540_s5, [#allocation11]  }
 0x29d   :  { %418 = dma.done.wait [#allocation5], 128  }
 0x29e   :  { %419 = vsyncadd [#allocation5], 4294967168 }
 0x29f   :  { %420 = dma.done.wait [#allocation11], 128  }
 0x2a0   :  { %421 = vsyncadd [#allocation11], 4294967168 }
 0x2a1   :  { %261 = vsyncpa [#allocation4], 1 }
 0x2a2   :  { %262 = vsyncpa [#allocation7], 1 }
 0x2a3   :  { %263 = vsyncpa [#allocation5], 1 }
 0x2a4   :  { %264 = vsyncpa [#allocation11], 1 }

</bundles_post_ra>
